<compile_context>
chip_gen: v7x
topology: tpu7x:2x2x1
jax: 0.10.0
libtpu: 0.0.40
codegen_flags: <defaults>
</compile_context>

<pallas_src>
import jax
import jax.numpy as jnp
from jax import lax
from jax.experimental import pallas as pl
from jax.experimental.pallas import tpu as pltpu


def _round_up(x, m):
    return ((x + m - 1) // m) * m


def _encoder_kernel(x_ref, w_ref, b_ref, o_ref):
    # x_ref: (Bt, L, E)    block of sentences (f32 or bf16)
    # w_ref: (3*Ep, Hp)    fused tap-stacked conv weights, bf16, H padded to Hp
    # b_ref: (1, Hp)       conv bias (f32, padded)
    # o_ref: (Bt, Hp)      pooled sentence embeddings (f32)
    Bt, L, E = x_ref.shape
    Hp = o_ref.shape[1]
    Ep = w_ref.shape[0] // 3
    M = Bt * L

    # Flatten sentences onto the sublane axis (L == 8 matches the sublane tile).
    x = x_ref[...].reshape(M, E)                                    # (M, E)

    # Per-sentence boundary masks from a single (M, 1) iota column; jnp.where broadcasts
    # the mask across lanes.  Zeroing the wrap-around rows implements the conv's zero
    # padding AND prevents cross-sentence / cross-block leakage from the rolls.
    rmod = lax.broadcasted_iota(jnp.int32, (M, 1), 0) % L
    x_prev = jnp.where(rmod == 0, 0.0, pltpu.roll(x, shift=1, axis=0))       # x[t-1]
    x_next = jnp.where(rmod == L - 1, 0.0, pltpu.roll(x, shift=M - 1, axis=0))  # x[t+1]

    # Fuse the three taps into one K = 3*Ep matmul: concat along lanes with per-tap zero
    # padding (E -> Ep) matching the row layout of w_ref.
    if Ep > E:
        zpad = jnp.zeros((M, Ep - E), x.dtype)
        xcat = jnp.concatenate([x_prev, zpad, x, zpad, x_next, zpad], axis=1)
    else:
        xcat = jnp.concatenate([x_prev, x, x_next], axis=1)         # (M, 3*Ep)

    # Single bf16 MXU pass (K=192 <= 256-deep MXU on v6e/v7x), f32 accumulation.
    s = jnp.dot(xcat.astype(jnp.bfloat16), w_ref[...],
                preferred_element_type=jnp.float32)                 # (M, Hp) f32

    # MaxPool1d over the full length, then bias + ReLU (valid: bias is time-constant and
    # ReLU is monotone, so relu(max_t(c_t) + b) == max_t(relu(c_t + b))).
    m = jnp.max(s.reshape(Bt, L, Hp), axis=1)                       # (Bt, Hp)
    o_ref[...] = jnp.maximum(m + b_ref[...], 0.0)


def prepare_params(weight, bias):
    """One-time parameter prep (hoisted off the per-call path).

    weight: (H, E, 3) PyTorch Conv1d layout; bias: (H,).
    Returns:
      w_cat: (3*Ep, Hp) bf16 — taps stacked along the contraction dim, each tap's E
             zero-padded to Ep (multiple of 8), H zero-padded to Hp (multiple of 128).
      b_pad: (1, Hp) f32 bias.
    """
    H, E, K = weight.shape
    Hp = _round_up(H, 128)                                          # 230 -> 256
    Ep = _round_up(E, 8)                                            # 60  -> 64
    w_taps = jnp.transpose(weight, (2, 1, 0))                       # (3, E, H), tap-major
    w_taps = jnp.pad(w_taps, ((0, 0), (0, Ep - E), (0, Hp - H)))    # (3, Ep, Hp)
    w_cat = w_taps.reshape(3 * Ep, Hp).astype(jnp.bfloat16)         # (192, 256)
    b_pad = jnp.pad(bias, (0, Hp - H)).reshape(1, Hp).astype(jnp.float32)
    return w_cat, b_pad


def encoder_forward(inputs, w_cat, b_pad, hidden_size, block_b=256):
    """inputs: (B, L, E); w_cat: (3*Ep, Hp) bf16; b_pad: (1, Hp). Returns (B, hidden_size) f32.

    block_b: max sentences per grid step.  Default 256 (~2048 matmul rows per step) amortizes
    the ~0.35us per-step pipeline overhead; keep <= ~512-1024 on v7x (64 MiB VMEM).  Passing
    bf16 `inputs` halves the input DMA (the kernel casts to bf16 regardless).
    """
    B, L, E = inputs.shape
    Hp = w_cat.shape[-1]

    # Near-even batch split: nsteps blocks of Bt sentences each, Bt a multiple of 8.
    # Padding waste is < 8 rows per step (vs. rounding B up to a multiple of block_b).
    B8 = _round_up(B, 8)
    nsteps = max(1, pl.cdiv(B8, block_b))
    Bt = _round_up(pl.cdiv(B8, nsteps), 8)
    B_pad = Bt * nsteps
    if B_pad != B:
        inputs = jnp.pad(inputs, ((0, B_pad - B), (0, 0), (0, 0)))

    out = pl.pallas_call(
        _encoder_kernel,
        out_shape=jax.ShapeDtypeStruct((B_pad, Hp), jnp.float32),
        grid_spec=pltpu.PrefetchScalarGridSpec(
            num_scalar_prefetch=0,
            grid=(nsteps,),
            in_specs=[
                pl.BlockSpec((Bt, L, E), lambda i: (i, 0, 0)),
                # Constant index_maps: weights/bias stay VMEM-resident across the grid.
                pl.BlockSpec(w_cat.shape, lambda i: (0, 0)),
                pl.BlockSpec((1, Hp), lambda i: (0, 0)),
            ],
            out_specs=pl.BlockSpec((Bt, Hp), lambda i: (i, 0)),
        ),
        compiler_params=pltpu.CompilerParams(
            dimension_semantics=("parallel",)),
    )(inputs, w_cat, b_pad)

    # Semantic fidelity with the PyTorch module: (B, hidden_size).  Consumers that can use
    # the zero-padded 256-wide output should keep only the [:B] slice to skip this copy.
    return out[:B, :hidden_size]


def encoder_reference(inputs, weight, bias):
    """Pure-JAX f32 reference mirroring the PyTorch module exactly."""
    B, L, E = inputs.shape
    xpad = jnp.pad(inputs, ((0, 0), (1, 1), (0, 0)))                # zero padding=1
    H = weight.shape[0]
    y = jnp.zeros((B, L, H), jnp.float32)
    for k in range(3):
        y = y + jnp.einsum("ble,he->blh", xpad[:, k:k + L, :], weight[:, :, k])
    y = y + bias[None, None, :]
    y = jnp.maximum(y, 0.0)
    return jnp.max(y, axis=1)                                       # (B, H)


if __name__ == "__main__":
    # Shapes consistent with the module defaults:
    #   max_length = 8, word_embedding_dim = 50, pos_embedding_dim = 5 -> E = 60
    #   hidden_size = 230, batch = 2
    B, L = 2, 8
    word_dim, pos_dim, hidden = 50, 5, 230
    E = word_dim + 2 * pos_dim

    key = jax.random.PRNGKey(0)
    kx, kw, kb = jax.random.split(key, 3)
    inputs = jax.random.normal(kx, (B, L, E), dtype=jnp.float32)
    # Deterministic synthetic Conv1d parameters (PyTorch layout: (out, in, k)).
    weight = jax.random.normal(kw, (hidden, E, 3), dtype=jnp.float32) * 0.1
    bias = jax.random.normal(kb, (hidden,), dtype=jnp.float32) * 0.1

    # Hoisted one-time param prep (tap fusion + padding + bf16 cast).
    w_cat, b_pad = prepare_params(weight, bias)

    # Small-batch run (single grid step).
    out = encoder_forward(inputs, w_cat, b_pad, hidden)
    out = jax.block_until_ready(out)
    ref = encoder_reference(inputs, weight, bias)
    assert out.shape == (B, hidden)
    # bf16 matmul operands: looser tolerance than the f32 reference.
    assert jnp.allclose(out, ref, atol=2e-2, rtol=2e-2), "mismatch vs reference (B=2)"

    # Larger batch with a small block_b to exercise multiple grid steps, uneven batch
    # padding, and per-sentence boundary masking inside each block.
    B2 = 40
    inputs2 = jax.random.normal(jax.random.PRNGKey(1), (B2, L, E), dtype=jnp.float32)
    out2 = jax.block_until_ready(
        encoder_forward(inputs2, w_cat, b_pad, hidden, block_b=16))
    ref2 = encoder_reference(inputs2, weight, bias)
    assert out2.shape == (B2, hidden)
    assert jnp.allclose(out2, ref2, atol=2e-2, rtol=2e-2), "mismatch vs reference (B=40)"

    print("KERNEL_OK")
</pallas_src>

<mosaic_0001>
module attributes {stable_mosaic.version = 11 : i64} {
  func.func @_encoder_kernel(%arg0: i32, %arg1: memref<8x8x60xf32, #tpu.memory_space<vmem>>, %arg2: memref<192x256xbf16, #tpu.memory_space<vmem>>, %arg3: memref<1x256xf32, #tpu.memory_space<vmem>>, %arg4: memref<8x256xf32, #tpu.memory_space<vmem>>) attributes {dimension_semantics = [#tpu.dimension_semantics<parallel>], iteration_bounds = array<i64: 1>, scalar_prefetch = 0 : i64, scratch_operands = 0 : i64, tpu.core_type = #tpu.core_type<tc>, window_params = [{transform_indices = @transform_0, window_bounds = array<i64: 8, 8, 60>}, {pipeline_mode = #tpu.pipeline_mode<synchronous>, transform_indices = @transform_1, window_bounds = array<i64: 192, 256>}, {pipeline_mode = #tpu.pipeline_mode<synchronous>, transform_indices = @transform_2, window_bounds = array<i64: 1, 256>}, {transform_indices = @transform_3, window_bounds = array<i64: 8, 256>}]} {
    %c0 = arith.constant 0 : index
    %c0_0 = arith.constant 0 : index
    %c0_1 = arith.constant 0 : index
    %0 = vector.load %arg1[%c0, %c0_0, %c0_1] : memref<8x8x60xf32, #tpu.memory_space<vmem>>, vector<8x8x60xf32>
    %1 = vector.shape_cast %0 : vector<8x8x60xf32> to vector<64x60xf32>
    %2 = tpu.iota {dimensions = array<i32: 0>} : vector<64x1xi32>
    %c8_i32 = arith.constant 8 : i32
    %c0_i32 = arith.constant 0 : i32
    %3 = arith.cmpi eq, %c8_i32, %c0_i32 : i32
    %c1_i32 = arith.constant 1 : i32
    %4 = arith.select %3, %c1_i32, %c8_i32 : i32
    %5 = vector.broadcast %4 : i32 to vector<64x1xi32>
    %6 = arith.remsi %2, %5 : vector<64x1xi32>
    %c0_i32_2 = arith.constant 0 : i32
    %7 = vector.broadcast %c0_i32_2 : i32 to vector<64x1xi32>
    %8 = arith.cmpi ne, %6, %7 : vector<64x1xi32>
    %c0_i32_3 = arith.constant 0 : i32
    %9 = vector.broadcast %c0_i32_3 : i32 to vector<64x1xi32>
    %10 = arith.cmpi slt, %6, %9 : vector<64x1xi32>
    %c0_i32_4 = arith.constant 0 : i32
    %11 = arith.cmpi slt, %4, %c0_i32_4 : i32
    %12 = vector.broadcast %11 : i1 to vector<64x1xi1>
    %13 = vector.broadcast %12 : vector<64x1xi1> to vector<64x1xi1>
    %14 = arith.xori %10, %13 : vector<64x1xi1>
    %15 = arith.andi %14, %8 : vector<64x1xi1>
    %16 = vector.broadcast %4 : i32 to vector<64x1xi32>
    %17 = arith.addi %6, %16 : vector<64x1xi32>
    %18 = arith.select %15, %17, %6 : vector<64x1xi1>, vector<64x1xi32>
    %c0_i32_5 = arith.constant 0 : i32
    %19 = vector.broadcast %c0_i32_5 : i32 to vector<64x1xi32>
    %20 = arith.cmpi eq, %18, %19 : vector<64x1xi32>
    %c1_i32_6 = arith.constant 1 : i32
    %21 = tpu.dynamic_rotate %1 by %c1_i32_6 dim 0 : vector<64x60xf32>, i32 -> vector<64x60xf32>
    %cst = arith.constant 0.000000e+00 : f32
    %22 = vector.shape_cast %20 : vector<64x1xi1> to vector<64x1xi1>
    %23 = vector.broadcast %22 : vector<64x1xi1> to vector<64x60xi1>
    %24 = vector.broadcast %cst : f32 to vector<64x60xf32>
    %25 = arith.select %23, %24, %21 : vector<64x60xi1>, vector<64x60xf32>
    %c7_i32 = arith.constant 7 : i32
    %26 = vector.broadcast %c7_i32 : i32 to vector<64x1xi32>
    %27 = arith.cmpi eq, %18, %26 : vector<64x1xi32>
    %c63_i32 = arith.constant 63 : i32
    %28 = tpu.dynamic_rotate %1 by %c63_i32 dim 0 : vector<64x60xf32>, i32 -> vector<64x60xf32>
    %cst_7 = arith.constant 0.000000e+00 : f32
    %29 = vector.shape_cast %27 : vector<64x1xi1> to vector<64x1xi1>
    %30 = vector.broadcast %29 : vector<64x1xi1> to vector<64x60xi1>
    %31 = vector.broadcast %cst_7 : f32 to vector<64x60xf32>
    %32 = arith.select %30, %31, %28 : vector<64x60xi1>, vector<64x60xf32>
    %cst_8 = arith.constant 0.000000e+00 : f32
    %33 = vector.broadcast %cst_8 : f32 to vector<64x4xf32>
    %34 = tpu.concatenate %25, %33, %1, %33, %32, %33 in 1 : vector<64x60xf32>, vector<64x4xf32>, vector<64x60xf32>, vector<64x4xf32>, vector<64x60xf32>, vector<64x4xf32> -> vector<64x192xf32>
    %35 = arith.truncf %34 : vector<64x192xf32> to vector<64x192xbf16>
    %c0_9 = arith.constant 0 : index
    %c0_10 = arith.constant 0 : index
    %36 = vector.load %arg2[%c0_9, %c0_10] : memref<192x256xbf16, #tpu.memory_space<vmem>>, vector<192x256xbf16>
    %cst_11 = arith.constant dense<0.000000e+00> : vector<64x256xf32>
    %37 = tpu.matmul %35, %36, %cst_11 {dimension_numbers = #tpu.dot_dimension_numbers<[1], [0], [0], [1], [0, 0, 1, 1], [], []>} : vector<64x192xbf16>, vector<192x256xbf16>, vector<64x256xf32> -> vector<64x256xf32>
    %38 = vector.shape_cast %37 : vector<64x256xf32> to vector<8x8x256xf32>
    %cst_12 = arith.constant dense<0xFF800000> : vector<8x256xf32>
    %39 = vector.multi_reduction <maximumf>, %38, %cst_12 [1] : vector<8x8x256xf32> to vector<8x256xf32>
    %c0_13 = arith.constant 0 : index
    %c0_14 = arith.constant 0 : index
    %40 = vector.load %arg3[%c0_13, %c0_14] : memref<1x256xf32, #tpu.memory_space<vmem>>, vector<1x256xf32>
    %41 = vector.broadcast %40 : vector<1x256xf32> to vector<8x256xf32>
    %42 = arith.addf %39, %41 : vector<8x256xf32>
    %cst_15 = arith.constant 0.000000e+00 : f32
    %43 = vector.broadcast %cst_15 : f32 to vector<8x256xf32>
    %44 = arith.maximumf %42, %43 : vector<8x256xf32>
    %c0_16 = arith.constant 0 : index
    %c0_17 = arith.constant 0 : index
    %45 = vector.load %arg4[%c0_16, %c0_17] : memref<8x256xf32, #tpu.memory_space<vmem>>, vector<8x256xf32>
    tpu.vector_store %arg4[%c0_16, %c0_17], %44 {strides = array<i32>} : memref<8x256xf32, #tpu.memory_space<vmem>>, vector<8x256xf32>,
    return
  }
  func.func @transform_0(%arg0: i32) -> (i32, i32, i32) {
    %c0_i32 = arith.constant 0 : i32
    %c0_i32_0 = arith.constant 0 : i32
    %c0_i32_1 = arith.constant 0 : i32
    return %arg0, %c0_i32, %c0_i32_0 : i32, i32, i32
  }
  func.func @transform_1(%arg0: i32) -> (i32, i32) {
    %c0_i32 = arith.constant 0 : i32
    %c0_i32_0 = arith.constant 0 : i32
    %c0_i32_1 = arith.constant 0 : i32
    return %c0_i32, %c0_i32_0 : i32, i32
  }
  func.func @transform_2(%arg0: i32) -> (i32, i32) {
    %c0_i32 = arith.constant 0 : i32
    %c0_i32_0 = arith.constant 0 : i32
    %c0_i32_1 = arith.constant 0 : i32
    return %c0_i32, %c0_i32_0 : i32, i32
  }
  func.func @transform_3(%arg0: i32) -> (i32, i32) {
    %c0_i32 = arith.constant 0 : i32
    %c0_i32_0 = arith.constant 0 : i32
    return %arg0, %c0_i32 : i32, i32
  }
}

</mosaic_0001>

<bundles_post_ra>
// kernel: tpu_custom_call.1
= control target key start
LH: loop header
LB: loop body
LE: loop exit
PB: predicated region body
PF: predicated region fallthrough
CT: control target
= control target key end

     0   :  { %8 = vsyncpa [#allocation3], 0  ;;  %s1341_s0 = inlined_call_operand.hbm [shape: f32[8,8,60], index: 0, kind: input, shape index: {}]   ;;  %s1342_s1 = inlined_call_operand.hbm [shape: bf16[192,256], index: 1, kind: input, shape index: {}]   ;;  %s1343_s2 = inlined_call_operand.vmem [shape: f32[1,256], index: 2, kind: input, shape index: {}]   ;;  %s1344_s3 = inlined_call_operand.hbm [shape: f32[8,256], index: 3, kind: output, shape index: {}]  }
   0x1   :  { %9 = vsyncpa [#allocation6], 0 }
   0x2   :  { %10 = vsyncpa [#allocation4], 0  ;;  %s968_s12 = smov [#allocation2]   ;;  %s896_s16 = scalar_lea.hbm %s1341_s0, 1024 }
   0x3   :  { %s16_s13 = sshll.u32 %s968_s12, 4  ;;  %p897_p0 = scmp.ne.s32.totalorder %s1341_s0, %s896_s16  ;;  %s17_s13 = int_to_ptr.vmem [resolvable:$true] %s16_s13 }
   0x4   :  { %p900_p1 = scmp.lt.u32.totalorder %s896_s16, %s1341_s0 }
   0x6   :  { %p902_p2 = pnand %p900_p1, %p897_p0 }
   0x8   :  { %905 = shalt.err (!%p902_p2)
}
   0x9   :  { %s906_s21 = scalar_lea.vmem %s17_s13, 1024  ;;  %p911_p4 = scmp.lt.s32.totalorder %s17_s13, %s17_s13 }
   0xa   :  { %p907_p3 = scmp.ne.s32.totalorder %s17_s13, %s906_s21  ;;  %p912_p5 = scmp.lt.s32.totalorder %s906_s21, %s906_s21 }
   0xc   :  { %p913_p6 = por %p912_p5, %p911_p4 }
   0xe   :  { %p914_p7 = pnand %p913_p6, %p907_p3 }
  0x10   :  { %917 = shalt.err (!%p914_p7)
}
  0x11   :  { %s969_s22 = smov 128   ;;  %s970_s23 = smov 8  }
  0x12   :  { %22 = dma.hbm_to_vmem [thread:$0]  %s1341_s0, 1024, %s17_s13, [#allocation3], %s969_s22, %s969_s22, %s970_s23  }
  0x13   :  { %s971_s26 = smov [#allocation5]   ;;  %s918_s30 = scalar_lea.hbm %s1342_s1, 3072 }
  0x14   :  { %s28_s27 = sshll.u32 %s971_s26, 4  ;;  %p919_p8 = scmp.ne.s32.totalorder %s1342_s1, %s918_s30  ;;  %s29_s27 = int_to_ptr.vmem [resolvable:$true] %s28_s27 }
  0x15   :  { %p922_p9 = scmp.lt.u32.totalorder %s918_s30, %s1342_s1 }
  0x17   :  { %p924_p10 = pnand %p922_p9, %p919_p8 }
  0x19   :  { %927 = shalt.err (!%p924_p10)
}
  0x1a   :  { %s928_s8 = scalar_lea.vmem %s29_s27, 3072  ;;  %p933_p12 = scmp.lt.s32.totalorder %s29_s27, %s29_s27 }
  0x1b   :  { %p929_p11 = scmp.ne.s32.totalorder %s29_s27, %s928_s8  ;;  %p934_p13 = scmp.lt.s32.totalorder %s928_s8, %s928_s8 }
  0x1d   :  { %p935_p0 = por %p934_p13, %p933_p12 }
  0x1f   :  { %p936_p1 = pnand %p935_p0, %p929_p11 }
  0x21   :  { %939 = shalt.err (!%p936_p1)
}
  0x22   :  { %34 = dma.hbm_to_vmem [thread:$0]  %s1342_s1, 3072, %s29_s27, [#allocation6], %s969_s22, %s969_s22, %s970_s23  }
  0x23   :  { %962 = dma.done.wait [#allocation3], 1024  }
  0x24   :  { %963 = vsyncadd [#allocation3], 4294966272 }
  0x25   :  { %964 = dma.done.wait [#allocation6], 3072  }
  0x26   :  { %965 = vsyncadd [#allocation6], 4294964224  ;;  %v52_v0 = vlaneseq  ;;  %vm287_vm1 = vcmask 490496   ;;  %v1032_v6 = vld [vmem:[#allocation2] sm:$0xff]  ;;  %v1034_v7 = vld [vmem:[#allocation2 + $0x8] sm:$0xff]  ;;  %s972_s1 = smov 64  }
  0x27   :  { %v1036_v8 = vld [vmem:[#allocation2 + $0x20] sm:$0xff]  ;;  %v840_v12 = vpack.i.bf16 %v1034_v7, %v1032_v6  ;;  %v1047_v13 = vld [vmem:[#allocation2 + $0x28] sm:$0xff]  ;;  %v1049_v14 = vld [vmem:[#allocation2 + $0x10] sm:$0xff]  ;;  %v166_v19 = vrot.slane %v1034_v7, 7  ;;  %v165_v20 = vrot.slane %v1032_v6, 7  ;;  %v215_v24 = vrot.slane %v1034_v7, 1 }
  0x28   :  { %v1018_v1 = vshrl.u32 %v52_v0, 7  ;;  %v1051_v15 = vld [vmem:[#allocation2 + $0x18] sm:$0xff]  ;;  %v170_v21 = vrot.slane %v1047_v13, 7  ;;  %v1062_v22 = vld [vmem:[#allocation2 + $0x30] sm:$0xff]  ;;  %v845_v25 = vpack.i.bf16 %v1047_v13, %v1036_v8  ;;  %v169_v26 = vrot.slane %v1036_v8, 7 }
  0x29   :  { %v51_v23 = vld [vmem:[#allocation2 + $0x38] sm:$0xff]  ;;  %841 = vrot.lane.b32.xlu0 %v840_v12, %s972_s1  ;;  %v168_v27 = vrot.slane %v1051_v15, 7  ;;  %v214_v29 = vrot.slane %v1032_v6, 1  ;;  %v850_v30 = vpack.i.bf16 %v1051_v15, %v1049_v14  ;;  %v167_v31 = vrot.slane %v1049_v14, 7  ;;  %v860_v33 = vld [vmem:[#allocation5 + $0x4] ss:$8 sps:$4 sm:$0xff]  }
  0x2a   :  { %v1021_v2 = vadd.s32 8, %v1018_v1  ;;  %v65_v3 = vand.u32 7, %v1018_v1  ;;  %v1025_v4 = vadd.s32 32, %v1018_v1  ;;  %v1028_v5 = vadd.s32 40, %v1018_v1  ;;  %v862_v38 = vld [vmem:[#allocation5] ss:$8 sps:$4 sm:$0xff]   ;;  %486 = vmatprep.subr.bf16.mxu0 %v860_v33  ;;  %810 = vmatprep.subr.bf16.mxu1 %v860_v33 }
  0x2b   :  { %vm173_vm0 = vcmp.lt.s32.totalorder %v1018_v1, 1  ;;  %vm222_vm2 = vcmp.lt.s32.totalorder %v1018_v1, 7  ;;  %v1040_v10 = vadd.s32 16, %v1018_v1  ;;  %v1043_v11 = vadd.s32 24, %v1018_v1  ;;  %851 = vrot.lane.b32.xlu1 %v850_v30, %s972_s1  ;;  %v863_v39 = vld [vmem:[#allocation5 + $0x14] ss:$8 sps:$4 sm:$0xff]   ;;  %487 = vmatpush1.bf16.msra.mxu0 %v862_v38 }
  0x2c   :  { %v72_v9 = vand.u32 7, %v1021_v2  ;;  %vm1053_vm3 = vcmp.eq.s32.totalorder %v65_v3, 0  ;;  %v93_v17 = vand.u32 7, %v1025_v4  ;;  %v100_v18 = vand.u32 7, %v1028_v5  ;;  %v865_v46 = vld [vmem:[#allocation5 + $0x10] ss:$8 sps:$4 sm:$0xff]   ;;  %488 = vmatprep.subr.bf16.mxu0 %v863_v39  ;;  %822 = vmatpush1.bf16.msra.mxu1 %v862_v38 }
  0x2d   :  { %vm1070_vm4 = vcmp.eq.s32.totalorder %v65_v3, 7  ;;  %v172_v32 = vrot.slane %v51_v23, 7  ;;  %v218_v34 = vrot.slane %v1036_v8, 1  ;;  %v217_v35 = vrot.slane %v1051_v15, 1  ;;  %846 = vrot.lane.b32.xlu0 %v845_v25, %s972_s1  ;;  %v866_v50 = vld [vmem:[#allocation5 + $0x24] ss:$8 sps:$4 sm:$0xff]   ;;  %811 = vmatprep.subr.bf16.mxu1 %v863_v39 }
  0x2e   :  { %v855_v36 = vpack.i.bf16 %v51_v23, %v1062_v22  ;;  %v171_v37 = vrot.slane %v1062_v22, 7  ;;  %vm1085_vm5 = vcmp.eq.s32.totalorder %v72_v9, 0  ;;  %v180_v41 = vsel %vm173_vm0, %v165_v20, %v166_v19  ;;  %v868_v62 = vld [vmem:[#allocation5 + $0x20] ss:$8 sps:$4 sm:$0xff]   ;;  %v869_v7 = vld [vmem:[#allocation5 + $0x34] ss:$8 sps:$4 sm:$0xff]  }
  0x2f   :  { %v181_v42 = vsel %vm173_vm0, %v172_v32, %v165_v20  ;;  %v176_v43 = vsel %vm173_vm0, %v169_v26, %v170_v21  ;;  %v216_v44 = vrot.slane %v1049_v14, 1  ;;  %v221_v45 = vrot.slane %v51_v23, 1  ;;  %489 = vmatpush1.bf16.msra.mxu0 %v865_v46  ;;  %v875_v30 = vld [vmem:[#allocation5 + $0x54] ss:$8 sps:$4 sm:$0xff]   ;;  %v877_v5 = vld [vmem:[#allocation5 + $0x50] ss:$8 sps:$4 sm:$0xff]  }
  0x30   :  { %v198_v47 = vsel %vm1053_vm3, 0.0, %v181_v42  ;;  %v177_v48 = vsel %vm173_vm0, %v168_v27, %v169_v26  ;;  %v220_v49 = vrot.slane %v1062_v22, 1  ;;  %v199_v51 = vsel %vm1085_vm5, 0.0, %v180_v41  ;;  %856 = vrot.lane.b32.xlu1 %v855_v36, %s972_s1  ;;  %490 = vmatprep.subr.bf16.mxu0 %v866_v50  ;;  %v878_v40 = vld [vmem:[#allocation5 + $0x64] ss:$8 sps:$4 sm:$0xff]  }
  0x31   :  { %v178_v52 = vsel %vm173_vm0, %v167_v31, %v168_v27  ;;  %v179_v53 = vsel %vm173_vm0, %v166_v19, %v167_v31  ;;  %v1109_v54 = vsel %vm287_vm1, %v198_v47, 0.0  ;;  %v1112_v55 = vsel %vm287_vm1, %v199_v51, 0.0  ;;  %823 = vmatpush1.bf16.msra.mxu1 %v865_v46  ;;  %v874_v27 = vld [vmem:[#allocation5 + $0x40] ss:$8 sps:$4 sm:$0xff]   ;;  %v883_v58 = vld [vmem:[#allocation5 + $0x70] ss:$8 sps:$4 sm:$0xff]  }
  0x32   :  { %v229_v56 = vsel %vm222_vm2, %v214_v29, %v215_v24  ;;  %v1118_v57 = vsel %vm173_vm0, %v171_v37, %v172_v32  ;;  %vm1123_vm6 = vcmp.eq.s32.totalorder %v93_v17, 0  ;;  %vm1129_vm7 = vcmp.eq.s32.totalorder %v100_v18, 0  ;;  %812 = vmatprep.subr.bf16.mxu1 %v866_v50  ;;  %v880_v50 = vld [vmem:[#allocation5 + $0x60] ss:$8 sps:$4 sm:$0xff]   ;;  %v884_v59 = vld [vmem:[#allocation5 + $0x84] ss:$8 sps:$4 sm:$0xff]  }
  0x33   :  { %v1135_v60 = vsel %vm173_vm0, %v170_v21, %v171_v37  ;;  %v1141_v61 = vsel %vm222_vm2, %v217_v35, %v218_v34  ;;  %v202_v63 = vsel %vm1123_vm6, 0.0, %v177_v48  ;;  %v1147_v0 = vsel %vm222_vm2, %v216_v44, %v217_v35  ;;  %491 = vmatpush1.bf16.msra.mxu0 %v868_v62  ;;  %v655_v35 = vld [vmem:[%s1343_s2] sm:$0x3]  ;;  %s973_s2 = smov [#allocation7]  }
  0x34   :  { %v1151_v3 = vsel %vm222_vm2, %v220_v49, %v221_v45  ;;  %v1155_v6 = vsel %vm222_vm2, %v221_v45, %v214_v29  ;;  %v203_v12 = vsel %vm1129_vm7, 0.0, %v176_v43  ;;  %v228_v14 = vsel %vm222_vm2, %v215_v24, %v216_v44  ;;  %492 = vmatprep.subr.bf16.mxu0 %v869_v7  ;;  %v872_v24 = vld [vmem:[#allocation5 + $0x44] ss:$8 sps:$4 sm:$0xff]   ;;  %s760_s12 = sshll.u32 %s973_s2, 4  ;;  %s761_s12 = int_to_ptr.vmem [resolvable:$true] %s760_s12 }
  0x35   :  { %v219_v15 = vrot.slane %v1047_v13, 1  ;;  %v1163_v16 = vsel %vm287_vm1, %v202_v63, 0.0  ;;  %v1166_v19 = vsel %vm287_vm1, %v203_v12, 0.0  ;;  %v79_v20 = vand.u32 7, %v1040_v10  ;;  %v871_v13 = vld [vmem:[#allocation5 + $0x30] ss:$8 sps:$4 sm:$0xff]   ;;  %824 = vmatpush1.bf16.msra.mxu1 %v868_v62  ;;  %p945_p3 = scmp.lt.s32.totalorder %s761_s12, %s761_s12 }
  0x36   :  { %vm207_vm8 = vcmp.eq.s32.totalorder %v72_v9, 7  ;;  %v247_v21 = vsel %vm1070_vm4, 0.0, %v229_v56  ;;  %v86_v22 = vand.u32 7, %v1043_v11  ;;  %813 = vmatprep.subr.bf16.mxu1 %v869_v7  ;;  %vm296_vm11 = vcmask 523264   ;;  %v881_v56 = vld [vmem:[#allocation5 + $0x74] ss:$8 sps:$4 sm:$0xff]  }
  0x37   :  { %v248_v23 = vsel %vm207_vm8, 0.0, %v228_v14  ;;  %v314_v25 = vsel %vm287_vm1, %v247_v21, 0.0  ;;  %vm159_vm9 = vcmp.eq.s32.totalorder %v79_v20, 0  ;;  %v224_v2 = vsel %vm222_vm2, %v219_v15, %v220_v49  ;;  %493 = vmatpush1.bf16.msra.mxu0 %v871_v13  ;;  %v889_v62 = vld [vmem:[#allocation5 + $0x90] ss:$8 sps:$4 sm:$0xff]   ;;  %s940_s13 = scalar_lea.vmem %s761_s12, 256 }
  0x38   :  { %v315_v26 = vsel %vm287_vm1, %v248_v23, 0.0  ;;  %vm160_vm10 = vcmp.eq.s32.totalorder %v86_v22, 0  ;;  %v200_v10 = vsel %vm159_vm9, 0.0, %v179_v53  ;;  %v225_v11 = vsel %vm222_vm2, %v218_v34, %v219_v15  ;;  %494 = vmatprep.subr.bf16.mxu0 %v872_v24  ;;  %v890_v63 = vld [vmem:[#allocation5 + $0xa4] ss:$8 sps:$4 sm:$0xff]   ;;  %p941_p2 = scmp.ne.s32.totalorder %s761_s12, %s940_s13  ;;  %p946_p4 = scmp.lt.s32.totalorder %s940_s13, %s940_s13 }
  0x39   :  { %v323_v9 = vpack.c.bf16 %v315_v26, %v314_v25  ;;  %v201_v28 = vsel %vm160_vm10, 0.0, %v178_v52  ;;  %v1183_v29 = vsel %vm287_vm1, %v200_v10, 0.0  ;;  %vm210_vm12 = vcmp.eq.s32.totalorder %v93_v17, 7  ;;  %825 = vmatpush1.bf16.msra.mxu1 %v871_v13 }
  0x3a   :  { %v1187_v31 = vsel %vm287_vm1, %v201_v28, 0.0  ;;  %vm211_vm13 = vcmp.eq.s32.totalorder %v100_v18, 7  ;;  %v59_v8 = vadd.s32 48, %v1018_v1  ;;  %v251_v32 = vsel %vm210_vm12, 0.0, %v225_v11  ;;  %814 = vmatprep.subr.bf16.mxu1 %v872_v24  ;;  %p947_p5 = por %p946_p4, %p945_p3 }
  0x3b   :  { %794 = vmatprep.mubr.msk.bf16.mxu0 %vm296_vm11, %v323_v9  ;;  %v252_v33 = vsel %vm211_vm13, 0.0, %v224_v2  ;;  %v60_v34 = vadd.s32 56, %v1018_v1  ;;  %vm1195_vm14 = vcmp.eq.s32.totalorder %v79_v20, 7  ;;  %v318_v36 = vsel %vm287_vm1, %v251_v32, 0.0  ;;  %495 = vmatpush1.bf16.msra.mxu0 %v874_v27 }
  0x3c   :  { %v319_v4 = vsel %vm287_vm1, %v252_v33, 0.0  ;;  %v107_v17 = vand.u32 7, %v59_v8  ;;  %vm209_vm15 = vcmp.eq.s32.totalorder %v86_v22, 7  ;;  %v249_v38 = vsel %vm1195_vm14, 0.0, %v1147_v0  ;;  %496 = vmatprep.subr.bf16.mxu0 %v875_v30  ;;  %v892_v0 = vld [vmem:[#allocation5 + $0xa0] ss:$8 sps:$4 sm:$0xff]   ;;  %p948_p6 = pnand %p947_p5, %p941_p2 }
  0x3d   :  { %v327_v18 = vpack.c.bf16 %v319_v4, %v318_v36  ;;  %v114_v37 = vand.u32 7, %v60_v34  ;;  %v250_v39 = vsel %vm209_vm15, 0.0, %v1141_v61  ;;  %v1206_v41 = vsel %vm287_vm1, %v249_v38, 0.0  ;;  %826 = vmatpush1.bf16.msra.mxu1 %v874_v27  ;;  %v887_v61 = vld [vmem:[#allocation5 + $0x94] ss:$8 sps:$4 sm:$0xff]  }
  0x3e   :  { %vm163_vm0 = vcmp.eq.s32.totalorder %v107_v17, 0  ;;  %v1209_v42 = vsel %vm287_vm1, %v250_v39, 0.0  ;;  %vm1211_vm2 = vcmp.eq.s32.totalorder %v107_v17, 7  ;;  %815 = vmatprep.subr.bf16.mxu1 %v875_v30  ;;  %v659_v33 = vsub.s32 0, %v1018_v1 }
  0x3f   :  { %802 = vmatprep.mubr.msk.bf16.mxu1 %vm296_vm11, %v327_v18  ;;  %vm164_vm3 = vcmp.eq.s32.totalorder %v114_v37, 0  ;;  %v204_v44 = vsel %vm163_vm0, 0.0, %v1135_v60  ;;  %v325_v45 = vpack.c.bf16 %v1209_v42, %v1206_v41  ;;  %vm213_vm4 = vcmp.eq.s32.totalorder %v114_v37, 7  ;;  %497 = vmatpush1.bf16.msra.mxu0 %v877_v5  ;;  %v886_v60 = vld [vmem:[#allocation5 + $0x80] ss:$8 sps:$4 sm:$0xff]  }
  0x40   :  { %v205_v46 = vsel %vm164_vm3, 0.0, %v1118_v57  ;;  %v1221_v47 = vsel %vm287_vm1, %v204_v44, 0.0  ;;  %v253_v48 = vsel %vm1211_vm2, 0.0, %v1151_v3  ;;  %v254_v49 = vsel %vm213_vm4, 0.0, %v1155_v6  ;;  %498 = vmatprep.subr.bf16.mxu0 %v878_v40  ;;  %v893_v3 = vld [vmem:[#allocation5 + $0xb4] ss:$8 sps:$4 sm:$0xff]  }
  0x41   :  { %v1228_v51 = vsel %vm287_vm1, %v205_v46, 0.0  ;;  %v1231_v52 = vsel %vm287_vm1, %v253_v48, 0.0  ;;  %v1234_v53 = vsel %vm287_vm1, %v254_v49, 0.0  ;;  %827 = vmatpush1.bf16.msra.mxu1 %v877_v5  ;;  %v895_v6 = vld [vmem:[#allocation5 + $0xb0] ss:$8 sps:$4 sm:$0xff]   ;;  %vm305_vm1 = vcmask 1014784  }
  0x42   :  { %v329_v57 = vpack.c.bf16 %v1234_v53, %v1231_v52  ;;  %816 = vmatprep.subr.bf16.mxu1 %v878_v40  ;;  %vm1242_vm5 = vmpackc.low %vm305_vm1, %vm305_vm1  ;;  %v663_v4 = vsub.s32 1, %v1018_v1  ;;  %v1279_v42 = vrot.slane %v655_v35, %v659_v33  ;;  %vm716_vm6 = vcmask 1041409  }
  0x43   :  { %499 = vmatpush1.bf16.msra.mxu0 %v880_v50  ;;  %vm719_vm7 = vcmask 1042434   ;;  %vm722_vm8 = vcmask 1043459   ;;  %vm725_vm9 = vcmask 1044484   ;;  %vm728_vm10 = vcmask 1045509  }
  0x44   :  { %500 = vmatprep.subr.bf16.mxu0 %v881_v56  ;;  %vm734_vm12 = vcmask 1047559  }
  0x45   :  { %828 = vmatpush1.bf16.msra.mxu1 %v880_v50 }
  0x46   :  { %817 = vmatprep.subr.bf16.mxu1 %v881_v56 }
  0x47   :  { %501 = vmatpush1.bf16.msra.mxu0 %v883_v58 }
  0x48   :  { %502 = vmatprep.subr.bf16.mxu0 %v884_v59 }
  0x49   :  { %829 = vmatpush1.bf16.msra.mxu1 %v883_v58 }
  0x4a   :  { %818 = vmatprep.subr.bf16.mxu1 %v884_v59 }
  0x4b   :  { %503 = vmatpush1.bf16.msra.mxu0 %v886_v60 }
  0x4c   :  { %504 = vmatprep.subr.bf16.mxu0 %v887_v61 }
  0x4d   :  { %830 = vmatpush1.bf16.msra.mxu1 %v886_v60 }
  0x4e   :  { %819 = vmatprep.subr.bf16.mxu1 %v887_v61 }
  0x4f   :  { %505 = vmatpush1.bf16.msra.mxu0 %v889_v62 }
  0x50   :  { %506 = vmatprep.subr.bf16.mxu0 %v890_v63 }
  0x51   :  { %831 = vmatpush1.bf16.msra.mxu1 %v889_v62 }
  0x52   :  { %820 = vmatprep.subr.bf16.mxu1 %v890_v63 }
  0x53   :  { %507 = vmatpush1.bf16.msra.mxu0 %v892_v0 }
  0x54   :  { %508 = vmatprep.subr.bf16.mxu0 %v893_v3 }
  0x55   :  { %832 = vmatpush1.bf16.msra.mxu1 %v892_v0 }
  0x56   :  { %821 = vmatprep.subr.bf16.mxu1 %v893_v3 }
  0x57   :  { %509 = vmatpush1.bf16.msra.mxu0 %v895_v6 }
  0x59   :  { %833 = vmatpush1.bf16.msra.mxu1 %v895_v6 }
  0x9b   :  { %v842_v7 = vpop.permute.xlu0 %841 }
  0x9c   :  { %v844_v12 = vunpack.i.h.bf16 %v842_v7  ;;  %v843_v14 = vunpack.i.l.bf16 %v842_v7 }
  0x9d   :  { %v852_v22 = vpop.permute.xlu1 %851 }
  0x9e   :  { %v297_v15 = vsel %vm296_vm11, %v1109_v54, %v843_v14  ;;  %v298_v20 = vsel %vm296_vm11, %v1112_v55, %v844_v12  ;;  %v854_v24 = vunpack.i.h.bf16 %v852_v22  ;;  %v853_v25 = vunpack.i.l.bf16 %v852_v22 }
  0x9f   :  { %v796_v13 = vpack.c.bf16 %v298_v20, %v297_v15  ;;  %v847_v23 = vpop.permute.xlu0 %846 }
  0xa0   :  { %v849_v26 = vunpack.i.h.bf16 %v847_v23  ;;  %v848_v2 = vunpack.i.l.bf16 %v847_v23  ;;  %v299_v54 = vsel %vm296_vm11, %v1183_v29, %v853_v25  ;;  %v300_v55 = vsel %vm296_vm11, %v1187_v31, %v854_v24 }
  0xa1   :  { %797 = vmatmul.mubr.msk.bf16.vlgmr.msra.gmra.mrb[0].mxu0 %vm1242_vm5, %v796_v13  ;;  %v800_v11 = vpack.c.bf16 %v300_v55, %v299_v54 }
  0xa2   :  { %v302_v9 = vsel %vm296_vm11, %v1166_v19, %v849_v26  ;;  %v301_v10 = vsel %vm296_vm11, %v1163_v16, %v848_v2  ;;  %v857_v27 = vpop.permute.xlu1 %856  ;;  %798 = vmatprep.mubr.msk.bf16.mxu0 %vm296_vm11, %v325_v45 }
  0xa3   :  { %v804_v28 = vpack.c.bf16 %v302_v9, %v301_v10  ;;  %v859_v30 = vunpack.i.h.bf16 %v857_v27  ;;  %v858_v8 = vunpack.i.l.bf16 %v857_v27 }
  0xa5   :  { %805 = vmatmul.mubr.msk.bf16.vlgmr.msra.gmra.mrb[0].mxu1 %vm1242_vm5, %v804_v28  ;;  %v304_v29 = vsel %vm296_vm11, %v1228_v51, %v859_v30  ;;  %v303_v19 = vsel %vm296_vm11, %v1221_v47, %v858_v8  ;;  %v1281_v47 = vrot.slane %v655_v35, %v663_v4 }
  0xa6   :  { %v808_v16 = vpack.c.bf16 %v304_v29, %v303_v19  ;;  %806 = vmatprep.mubr.msk.bf16.mxu1 %vm296_vm11, %v329_v57  ;;  %vm731_vm11 = vcmask 1046534  }
  0xa9   :  { %801 = vmatmul.mubr.msk.bf16.gmra.mrb[4].mxu0 %vm1242_vm5, %v800_v11 }
  0xad   :  { %809 = vmatmul.mubr.msk.bf16.gmra.mrb[4].mxu1 %vm1242_vm5, %v808_v16 }
 0x174   :  { %v520_v31 = vpop.f32.mrb[0].mxu0 }
 0x175   :  { %v559_v32 = vrot.slane %v520_v31, 4  ;;  %v522_v34 = vpop.f32.mrb[1].mxu0 }
 0x176   :  { %v565_v36 = vrot.slane %v522_v34, 4  ;;  %v524_v17 = vpop.f32.mrb[2].mxu0 }
 0x177   :  { %v560_v5 = vmax.f32 %v520_v31, %v559_v32  ;;  %v571_v18 = vrot.slane %v524_v17, 4  ;;  %v526_v37 = vpop.f32.mrb[3].mxu0 }
 0x178   :  { %v566_v38 = vmax.f32 %v522_v34, %v565_v36  ;;  %v577_v39 = vrot.slane %v526_v37, 4  ;;  %v540_v40 = vpop.f32.mrb[0].mxu1 }
 0x179   :  { %v561_v41 = vrot.slane %v560_v5, 2  ;;  %v572_v43 = vmax.f32 %v524_v17, %v571_v18  ;;  %v607_v44 = vrot.slane %v540_v40, 4  ;;  %v542_v45 = vpop.f32.mrb[1].mxu1 }
 0x17a   :  { %v567_v46 = vrot.slane %v566_v38, 2  ;;  %v578_v48 = vmax.f32 %v526_v37, %v577_v39  ;;  %v613_v49 = vrot.slane %v542_v45, 4  ;;  %v544_v50 = vpop.f32.mrb[2].mxu1 }
 0x17b   :  { %v562_v1 = vmax.f32 %v560_v5, %v561_v41  ;;  %v573_v51 = vrot.slane %v572_v43, 2  ;;  %v608_v52 = vmax.f32 %v540_v40, %v607_v44  ;;  %v619_v53 = vrot.slane %v544_v50, 4  ;;  %v546_v56 = vpop.f32.mrb[3].mxu1 }
 0x17c   :  { %v568_v57 = vmax.f32 %v566_v38, %v567_v46  ;;  %v579_v58 = vrot.slane %v578_v48, 2  ;;  %v614_v59 = vmax.f32 %v542_v45, %v613_v49  ;;  %v625_v60 = vrot.slane %v546_v56, 4  ;;  %v530_v61 = vpop.f32.mrb[4].mxu0 }
 0x17d   :  { %v563_v62 = vrot.slane %v562_v1, 1  ;;  %v574_v63 = vmax.f32 %v572_v43, %v573_v51  ;;  %v609_v0 = vrot.slane %v608_v52, 2  ;;  %v620_v3 = vmax.f32 %v544_v50, %v619_v53  ;;  %v532_v6 = vpop.f32.mrb[5].mxu0 }
 0x17e   :  { %v569_v7 = vrot.slane %v568_v57, 1  ;;  %v580_v12 = vmax.f32 %v578_v48, %v579_v58  ;;  %v615_v14 = vrot.slane %v614_v59, 2  ;;  %v626_v15 = vmax.f32 %v546_v56, %v625_v60  ;;  %v534_v20 = vpop.f32.mrb[6].mxu0 }
 0x17f   :  { %v564_v21 = vmax.f32 %v562_v1, %v563_v62  ;;  %v575_v22 = vrot.slane %v574_v63, 1  ;;  %v610_v13 = vmax.f32 %v608_v52, %v609_v0  ;;  %v621_v23 = vrot.slane %v620_v3, 2  ;;  %v536_v24 = vpop.f32.mrb[7].mxu0 }
 0x180   :  { %v570_v25 = vmax.f32 %v568_v57, %v569_v7  ;;  %v581_v26 = vrot.slane %v580_v12, 1  ;;  %v616_v2 = vmax.f32 %v614_v59, %v615_v14  ;;  %v627_v54 = vrot.slane %v626_v15, 2  ;;  %v550_v55 = vpop.f32.mrb[4].mxu1 }
 0x181   :  { %v576_v9 = vmax.f32 %v574_v63, %v575_v22  ;;  %v611_v10 = vrot.slane %v610_v13, 1  ;;  %v622_v11 = vmax.f32 %v620_v3, %v621_v23  ;;  %v552_v27 = vpop.f32.mrb[5].mxu1  ;;  %v667_v19 = vadd.f32 %v1279_v42, %v564_v21 }
 0x182   :  { %v582_v28 = vmax.f32 %v580_v12, %v581_v26  ;;  %v617_v30 = vrot.slane %v616_v2, 1  ;;  %v628_v8 = vmax.f32 %v626_v15, %v627_v54  ;;  %v554_v29 = vpop.f32.mrb[6].mxu1  ;;  %v668_v34 = vadd.f32 %v1281_v47, %v570_v25 }
 0x183   :  { %v669_v16 = vadd.f32 %v1279_v42, %v576_v9  ;;  %v612_v31 = vmax.f32 %v610_v13, %v611_v10  ;;  %v623_v32 = vrot.slane %v622_v11, 1  ;;  %v556_v33 = vpop.f32.mrb[7].mxu1  ;;  %v583_v18 = vrot.slane %v530_v61, 4 }
 0x184   :  { %v670_v35 = vadd.f32 %v1281_v47, %v582_v28  ;;  %v618_v36 = vmax.f32 %v616_v2, %v617_v30  ;;  %v629_v4 = vrot.slane %v628_v8, 1  ;;  %v589_v40 = vrot.slane %v532_v6, 4 }
 0x185   :  { %v685_v17 = vmax.f32 %v669_v16, 0.0  ;;  %v624_v5 = vmax.f32 %v622_v11, %v623_v32  ;;  %v1288_v38 = vadd.f32 %v1279_v42, %v612_v31  ;;  %v683_v41 = vmax.f32 %v667_v19, 0.0 }
 0x186   :  { %v686_v37 = vmax.f32 %v670_v35, 0.0  ;;  %v1291_v39 = vadd.f32 %v1281_v47, %v618_v36  ;;  %v630_v44 = vmax.f32 %v628_v8, %v629_v4  ;;  %v584_v45 = vmax.f32 %v530_v61, %v583_v18 }
 0x187   :  { %v715_v43 = vrot.slane %v685_v17, 7  ;;  %v684_v46 = vmax.f32 %v668_v34, 0.0  ;;  %v1294_v49 = vadd.f32 %v1279_v42, %v624_v5  ;;  %v590_v50 = vmax.f32 %v532_v6, %v589_v40 }
 0x188   :  { %v736_v48 = vrot.slane %v686_v37, 7  ;;  %v585_v51 = vrot.slane %v584_v45, 2  ;;  %v691_v53 = vmax.f32 %v1288_v38, 0.0  ;;  %v692_v56 = vmax.f32 %v1291_v39, 0.0 }
 0x189   :  { %v717_v1 = vsel %vm716_vm6, %v715_v43, %v683_v41  ;;  %v591_v57 = vrot.slane %v590_v50, 2  ;;  %v1301_v58 = vadd.f32 %v1281_v47, %v630_v44  ;;  %v595_v60 = vrot.slane %v534_v20, 4 }
 0x18a   :  { %v737_v52 = vsel %vm716_vm6, %v736_v48, %v684_v46  ;;  %v586_v59 = vmax.f32 %v584_v45, %v585_v51  ;;  %v601_v61 = vrot.slane %v536_v24, 4  ;;  %v693_v62 = vmax.f32 %v1294_v49, 0.0 }
 0x18b   :  { %v592_v63 = vmax.f32 %v590_v50, %v591_v57  ;;  %v631_v0 = vrot.slane %v550_v55, 4  ;;  %v637_v3 = vrot.slane %v552_v27, 4  ;;  %v596_v7 = vmax.f32 %v534_v20, %v595_v60 }
 0x18c   :  { %v587_v6 = vrot.slane %v586_v59, 1  ;;  %v602_v12 = vmax.f32 %v536_v24, %v601_v61  ;;  %v643_v14 = vrot.slane %v554_v29, 4  ;;  %v649_v13 = vrot.slane %v556_v33, 4 }
 0x18d   :  { %v593_v15 = vrot.slane %v592_v63, 1  ;;  %v632_v21 = vmax.f32 %v550_v55, %v631_v0  ;;  %v638_v22 = vmax.f32 %v552_v27, %v637_v3  ;;  %v597_v25 = vrot.slane %v596_v7, 2 }
 0x18e   :  { %v588_v23 = vmax.f32 %v586_v59, %v587_v6  ;;  %v603_v26 = vrot.slane %v602_v12, 2  ;;  %v644_v2 = vmax.f32 %v554_v29, %v643_v14  ;;  %v650_v11 = vmax.f32 %v556_v33, %v649_v13 }
 0x18f   :  { %v594_v54 = vmax.f32 %v592_v63, %v593_v15  ;;  %v633_v9 = vrot.slane %v632_v21, 2  ;;  %v639_v10 = vrot.slane %v638_v22, 2  ;;  %v598_v30 = vmax.f32 %v596_v7, %v597_v25 }
 0x190   :  { %v671_v28 = vadd.f32 %v1279_v42, %v588_v23  ;;  %v604_v8 = vmax.f32 %v602_v12, %v603_v26  ;;  %v645_v19 = vrot.slane %v644_v2, 2  ;;  %v651_v27 = vrot.slane %v650_v11, 2 }
 0x191   :  { %v672_v20 = vadd.f32 %v1281_v47, %v594_v54  ;;  %v634_v24 = vmax.f32 %v632_v21, %v633_v9  ;;  %v640_v55 = vmax.f32 %v638_v22, %v639_v10  ;;  %v599_v31 = vrot.slane %v598_v30, 1 }
 0x192   :  { %v687_v16 = vmax.f32 %v671_v28, 0.0  ;;  %v605_v32 = vrot.slane %v604_v8, 1  ;;  %v646_v34 = vmax.f32 %v644_v2, %v645_v19  ;;  %v652_v33 = vmax.f32 %v650_v11, %v651_v27 }
 0x193   :  { %v688_v29 = vmax.f32 %v672_v20, 0.0  ;;  %v635_v35 = vrot.slane %v634_v24, 1  ;;  %v641_v36 = vrot.slane %v640_v55, 1  ;;  %v600_v17 = vmax.f32 %v598_v30, %v599_v31 }
 0x194   :  { %v718_v4 = vrot.slane %v687_v16, 6  ;;  %v606_v5 = vmax.f32 %v604_v8, %v605_v32  ;;  %v647_v18 = vrot.slane %v646_v34, 1  ;;  %v653_v43 = vrot.slane %v652_v33, 1 }
 0x195   :  { %v738_v37 = vrot.slane %v688_v29, 6  ;;  %v636_v40 = vmax.f32 %v634_v24, %v635_v35  ;;  %v642_v41 = vmax.f32 %v640_v55, %v641_v36  ;;  %v673_v45 = vadd.f32 %v1279_v42, %v600_v17 }
 0x196   :  { %v720_v44 = vsel %vm719_vm7, %v718_v4, %v717_v1  ;;  %v674_v46 = vadd.f32 %v1281_v47, %v606_v5  ;;  %v648_v48 = vmax.f32 %v646_v34, %v647_v18  ;;  %v654_v59 = vmax.f32 %v652_v33, %v653_v43 }
 0x197   :  { %v739_v50 = vsel %vm719_vm7, %v738_v37, %v737_v52  ;;  %v679_v51 = vadd.f32 %v1279_v42, %v636_v40  ;;  %v680_v57 = vadd.f32 %v1281_v47, %v642_v41  ;;  %v694_v60 = vmax.f32 %v1301_v58, 0.0 }
 0x198   :  { %v689_v61 = vmax.f32 %v673_v45, 0.0  ;;  %v690_v63 = vmax.f32 %v674_v46, 0.0  ;;  %v681_v0 = vadd.f32 %v1279_v42, %v648_v48  ;;  %v724_v1 = vrot.slane %v691_v53, 4 }
 0x199   :  { %v695_v3 = vmax.f32 %v679_v51, 0.0  ;;  %v696_v6 = vmax.f32 %v680_v57, 0.0  ;;  %v682_v7 = vadd.f32 %v1281_v47, %v654_v59  ;;  %v742_v52 = vrot.slane %v692_v56, 4 }
 0x19a   :  { %v721_v12 = vrot.slane %v689_v61, 5  ;;  %v740_v14 = vrot.slane %v690_v63, 5  ;;  %v697_v15 = vmax.f32 %v681_v0, 0.0  ;;  %v727_v58 = vrot.slane %v693_v62, 3 }
 0x19b   :  { %v730_v21 = vrot.slane %v695_v3, 2  ;;  %v746_v22 = vrot.slane %v696_v6, 2  ;;  %v698_v13 = vmax.f32 %v682_v7, 0.0  ;;  %v744_v42 = vrot.slane %v694_v60, 3 }
 0x19c   :  { %v723_v38 = vsel %vm722_vm8, %v721_v12, %v720_v44  ;;  %v741_v53 = vsel %vm722_vm8, %v740_v14, %v739_v50  ;;  %v733_v23 = vrot.slane %v697_v15, 1 }
 0x19d   :  { %v748_v47 = vrot.slane %v698_v13, 1  ;;  %v726_v39 = vsel %vm725_vm9, %v724_v1, %v723_v38  ;;  %v743_v56 = vsel %vm725_vm9, %v742_v52, %v741_v53 }
 0x19e   :  { %v729_v49 = vsel %vm728_vm10, %v727_v58, %v726_v39  ;;  %v745_v62 = vsel %vm728_vm10, %v744_v42, %v743_v56 }
 0x19f   :  { %v732_v25 = vsel %vm731_vm11, %v730_v21, %v729_v49  ;;  %v747_v26 = vsel %vm731_vm11, %v746_v22, %v745_v62 }
 0x1a0   :  { %v735_v2 = vsel %vm734_vm12, %v733_v23, %v732_v25  ;;  %v749_v54 = vsel %vm734_vm12, %v748_v47, %v747_v26 }
 0x1a1   :  { %752 = vst [vmem:[#allocation7] sm:$0xff] %v735_v2  ;;  %753 = vst [vmem:[#allocation7 + $0x8] sm:$0xff] %v749_v54 }
 0x1a2   :  { %951 = shalt.err (!%p948_p6)
}
 0x1a3   :  { %s952_s16 = scalar_lea.hbm %s1344_s3, 256 }
 0x1a4   :  { %p953_p7 = scmp.ne.s32.totalorder %s1344_s3, %s952_s16  ;;  %p956_p8 = scmp.lt.u32.totalorder %s952_s16, %s1344_s3 }
 0x1a6   :  { %p958_p9 = pnand %p956_p8, %p953_p7 }
 0x1a8   :  { %961 = shalt.err (!%p958_p9)
}
 0x1a9   :  { %763 = dma.vmem_to_hbm [thread:$0]  %s761_s12, 256, %s1344_s3, [#allocation4]  }
 0x1aa   :  { %966 = dma.done.wait [#allocation4], 256  }
 0x1ab   :  { %967 = vsyncadd [#allocation4], 4294967040 }
 0x1ac   :  { %767 = vsyncpa [#allocation3], 1 }
 0x1ad   :  { %768 = vsyncpa [#allocation6], 1 }
 0x1ae   :  { %769 = vsyncpa [#allocation4], 1 }

</bundles_post_ra>
